<compile_context>
chip_gen: v7x
topology: tpu7x:2x2x1
jax: 0.10.0
libtpu: 0.0.40
codegen_flags: <defaults>
</compile_context>

<pallas_src>
import functools

import jax
import jax.numpy as jnp
from jax.experimental import pallas as pl
from jax.experimental.pallas import tpu as pltpu


def _mlp_logsoftmax_kernel(x_ref, w1_ref, b1_ref, w2_ref, b2_ref, w3_ref, b3_ref, o_ref):
    x = x_ref[...]

    # Linear 1 + ReLU
    h = jnp.dot(x, w1_ref[...], preferred_element_type=jnp.float32) + b1_ref[...]
    h = jnp.maximum(h, 0.0)

    # Linear 2 + ReLU
    h = jnp.dot(h, w2_ref[...], preferred_element_type=jnp.float32) + b2_ref[...]
    h = jnp.maximum(h, 0.0)

    # Linear 3
    logits = jnp.dot(h, w3_ref[...], preferred_element_type=jnp.float32) + b3_ref[...]

    # log_softmax over the last dim (numerically stable shifted-LSE form)
    m = jnp.max(logits, axis=-1, keepdims=True)
    shifted = logits - m
    lse = jnp.log(jnp.sum(jnp.exp(shifted), axis=-1, keepdims=True))
    o_ref[...] = (shifted - lse).astype(o_ref.dtype)


def _round_up(n, m):
    return ((n + m - 1) // m) * m


@functools.partial(jax.jit, static_argnames=("tm_hint",))
def output_sequence_layer(s, params, tm_hint=512):
    """s: (B, S, C) float32. params: dict of w1,b1,w2,b2,w3,b3."""
    B, S, C = s.shape
    out_dim = params["w3"].shape[1]

    n = B * S
    tm = tm_hint if n >= tm_hint else max(8, _round_up(n, 8))
    n_pad = _round_up(n, tm)
    grid = (n_pad // tm,)

    # Row padding only (feature dims stay untouched -> no extra HBM passes).
    x2d = s.reshape(n, C)
    if n_pad != n:
        x2d = jnp.pad(x2d, ((0, n_pad - n), (0, 0)))

    b1 = params["b1"].reshape(1, C)
    b2 = params["b2"].reshape(1, C)
    b3 = params["b3"].reshape(1, out_dim)

    # --- specs --------------------------------------------------------------
    x_spec = pl.BlockSpec((tm, C), lambda i: (i, 0))
    w_sq_spec = pl.BlockSpec((C, C), lambda i: (0, 0))
    b_c_spec = pl.BlockSpec((1, C), lambda i: (0, 0))
    w3_spec = pl.BlockSpec((C, out_dim), lambda i: (0, 0))
    b3_spec = pl.BlockSpec((1, out_dim), lambda i: (0, 0))
    out_spec = pl.BlockSpec((tm, out_dim), lambda i: (i, 0))

    # --- VMEM budget & cost estimate (use internally-padded tile sizes) -----
    c_lanes = _round_up(max(C, 128), 128)
    o_lanes = _round_up(max(out_dim, 128), 128)
    resident_bytes = 4 * (2 * C * c_lanes + C * o_lanes + 2 * c_lanes + o_lanes)
    pipeline_bytes = 4 * 2 * (tm * c_lanes + tm * o_lanes)  # double-buffered x / out tiles
    vmem_limit = min(2 * (resident_bytes + pipeline_bytes) + (8 << 20), 100 << 20)

    cost = pl.CostEstimate(
        flops=n_pad * (4 * C * C + 2 * C * out_dim),
        transcendentals=n_pad * (out_dim + 1),
        bytes_accessed=4 * (n_pad * C + n_pad * out_dim + 2 * C * C + C * out_dim + 2 * C + out_dim),
    )

    fn = pl.pallas_call(
        _mlp_logsoftmax_kernel,
        out_shape=jax.ShapeDtypeStruct((n_pad, out_dim), jnp.float32),
        grid=grid,
        in_specs=[x_spec, w_sq_spec, b_c_spec, w_sq_spec, b_c_spec, w3_spec, b3_spec],
        out_specs=out_spec,
        compiler_params=pltpu.CompilerParams(
            dimension_semantics=("parallel",),
            vmem_limit_bytes=vmem_limit,
        ),
        cost_estimate=cost,
    )
    y2d = fn(x2d, params["w1"], b1, params["w2"], b2, params["w3"], b3)
    return y2d[:n].reshape(B, S, out_dim)


def init_params(key, c, out):
    """Deterministic synthetic init (relu -> He-ish, final -> tiny so log_softmax is non-trivial)."""
    k1, k2, k3 = jax.random.split(key, 3)
    scale_relu = jnp.sqrt(2.0 / c)
    w1 = jax.random.normal(k1, (c, c), jnp.float32) * scale_relu
    b1 = jnp.zeros((c,), jnp.float32)
    w2 = jax.random.normal(k2, (c, c), jnp.float32) * scale_relu
    b2 = jnp.zeros((c,), jnp.float32)
    w3 = jax.random.normal(k3, (c, out), jnp.float32) * 0.01
    b3 = jnp.zeros((out,), jnp.float32)
    return {"w1": w1, "b1": b1, "w2": w2, "b2": b2, "w3": w3, "b3": b3}


def reference(s, p):
    h = jnp.maximum(s @ p["w1"] + p["b1"], 0.0)
    h = jnp.maximum(h @ p["w2"] + p["b2"], 0.0)
    logits = h @ p["w3"] + p["b3"]
    return jax.nn.log_softmax(logits, axis=-1)


if __name__ == "__main__":
    # Small shapes consistent with the module: d_msa = 32 channels, out = 20 amino-acid logits.
    B, S, C, OUT = 2, 8, 32, 20
    key = jax.random.PRNGKey(0)
    kx, kp = jax.random.split(key)
    s = jax.random.normal(kx, (B, S, C), jnp.float32)
    params = init_params(kp, C, OUT)

    y = output_sequence_layer(s, params)
    jax.block_until_ready(y)

    y_ref = reference(s, params)
    assert y.shape == (B, S, OUT), y.shape
    err = float(jnp.max(jnp.abs(y - y_ref)))
    assert jnp.allclose(y, y_ref, atol=2e-4, rtol=2e-4), err

    print("KERNEL_OK")
</pallas_src>

<mosaic_0001>
module attributes {stable_mosaic.version = 11 : i64} {
  func.func @_mlp_logsoftmax_kernel(%arg0: i32, %arg1: memref<16x32xf32, #tpu.memory_space<vmem>>, %arg2: memref<32x32xf32, #tpu.memory_space<vmem>>, %arg3: memref<1x32xf32, #tpu.memory_space<vmem>>, %arg4: memref<32x32xf32, #tpu.memory_space<vmem>>, %arg5: memref<1x32xf32, #tpu.memory_space<vmem>>, %arg6: memref<32x20xf32, #tpu.memory_space<vmem>>, %arg7: memref<1x20xf32, #tpu.memory_space<vmem>>, %arg8: memref<16x20xf32, #tpu.memory_space<vmem>>) attributes {dimension_semantics = [#tpu.dimension_semantics<parallel>], iteration_bounds = array<i64: 1>, scalar_prefetch = 0 : i64, scratch_operands = 0 : i64, tpu.core_type = #tpu.core_type<tc>, window_params = [{transform_indices = @transform_0, window_bounds = array<i64: 16, 32>}, {pipeline_mode = #tpu.pipeline_mode<synchronous>, transform_indices = @transform_1, window_bounds = array<i64: 32, 32>}, {pipeline_mode = #tpu.pipeline_mode<synchronous>, transform_indices = @transform_2, window_bounds = array<i64: 1, 32>}, {pipeline_mode = #tpu.pipeline_mode<synchronous>, transform_indices = @transform_3, window_bounds = array<i64: 32, 32>}, {pipeline_mode = #tpu.pipeline_mode<synchronous>, transform_indices = @transform_4, window_bounds = array<i64: 1, 32>}, {pipeline_mode = #tpu.pipeline_mode<synchronous>, transform_indices = @transform_5, window_bounds = array<i64: 32, 20>}, {pipeline_mode = #tpu.pipeline_mode<synchronous>, transform_indices = @transform_6, window_bounds = array<i64: 1, 20>}, {transform_indices = @transform_7, window_bounds = array<i64: 16, 20>}]} {
    %c0 = arith.constant 0 : index
    %c0_0 = arith.constant 0 : index
    %0 = vector.load %arg1[%c0, %c0_0] : memref<16x32xf32, #tpu.memory_space<vmem>>, vector<16x32xf32>
    %c0_1 = arith.constant 0 : index
    %c0_2 = arith.constant 0 : index
    %1 = vector.load %arg2[%c0_1, %c0_2] : memref<32x32xf32, #tpu.memory_space<vmem>>, vector<32x32xf32>
    %cst = arith.constant dense<0.000000e+00> : vector<16x32xf32>
    %2 = tpu.matmul %0, %1, %cst {dimension_numbers = #tpu.dot_dimension_numbers<[1], [0], [0], [1], [0, 0, 1, 1], [], []>} : vector<16x32xf32>, vector<32x32xf32>, vector<16x32xf32> -> vector<16x32xf32>
    %c0_3 = arith.constant 0 : index
    %c0_4 = arith.constant 0 : index
    %3 = vector.load %arg3[%c0_3, %c0_4] : memref<1x32xf32, #tpu.memory_space<vmem>>, vector<1x32xf32>
    %4 = vector.broadcast %3 : vector<1x32xf32> to vector<16x32xf32>
    %5 = arith.addf %2, %4 : vector<16x32xf32>
    %cst_5 = arith.constant 0.000000e+00 : f32
    %6 = vector.broadcast %cst_5 : f32 to vector<16x32xf32>
    %7 = arith.maximumf %5, %6 : vector<16x32xf32>
    %c0_6 = arith.constant 0 : index
    %c0_7 = arith.constant 0 : index
    %8 = vector.load %arg4[%c0_6, %c0_7] : memref<32x32xf32, #tpu.memory_space<vmem>>, vector<32x32xf32>
    %cst_8 = arith.constant dense<0.000000e+00> : vector<16x32xf32>
    %9 = tpu.matmul %7, %8, %cst_8 {dimension_numbers = #tpu.dot_dimension_numbers<[1], [0], [0], [1], [0, 0, 1, 1], [], []>} : vector<16x32xf32>, vector<32x32xf32>, vector<16x32xf32> -> vector<16x32xf32>
    %c0_9 = arith.constant 0 : index
    %c0_10 = arith.constant 0 : index
    %10 = vector.load %arg5[%c0_9, %c0_10] : memref<1x32xf32, #tpu.memory_space<vmem>>, vector<1x32xf32>
    %11 = vector.broadcast %10 : vector<1x32xf32> to vector<16x32xf32>
    %12 = arith.addf %9, %11 : vector<16x32xf32>
    %cst_11 = arith.constant 0.000000e+00 : f32
    %13 = vector.broadcast %cst_11 : f32 to vector<16x32xf32>
    %14 = arith.maximumf %12, %13 : vector<16x32xf32>
    %c0_12 = arith.constant 0 : index
    %c0_13 = arith.constant 0 : index
    %15 = vector.load %arg6[%c0_12, %c0_13] : memref<32x20xf32, #tpu.memory_space<vmem>>, vector<32x20xf32>
    %cst_14 = arith.constant dense<0.000000e+00> : vector<16x20xf32>
    %16 = tpu.matmul %14, %15, %cst_14 {dimension_numbers = #tpu.dot_dimension_numbers<[1], [0], [0], [1], [0, 0, 1, 1], [], []>} : vector<16x32xf32>, vector<32x20xf32>, vector<16x20xf32> -> vector<16x20xf32>
    %c0_15 = arith.constant 0 : index
    %c0_16 = arith.constant 0 : index
    %17 = vector.load %arg7[%c0_15, %c0_16] : memref<1x20xf32, #tpu.memory_space<vmem>>, vector<1x20xf32>
    %18 = vector.broadcast %17 : vector<1x20xf32> to vector<16x20xf32>
    %19 = arith.addf %16, %18 : vector<16x20xf32>
    %cst_17 = arith.constant dense<0xFF800000> : vector<16xf32>
    %20 = vector.multi_reduction <maximumf>, %19, %cst_17 [1] : vector<16x20xf32> to vector<16xf32>
    %21 = vector.shape_cast %20 : vector<16xf32> to vector<16x1xf32>
    %22 = vector.broadcast %21 : vector<16x1xf32> to vector<16x20xf32>
    %23 = arith.subf %19, %22 : vector<16x20xf32>
    %24 = math.exp %23 : vector<16x20xf32>
    %cst_18 = arith.constant dense<0.000000e+00> : vector<16xf32>
    %25 = vector.multi_reduction <add>, %24, %cst_18 [1] : vector<16x20xf32> to vector<16xf32>
    %26 = vector.shape_cast %25 : vector<16xf32> to vector<16x1xf32>
    %27 = math.log %26 : vector<16x1xf32>
    %28 = vector.broadcast %27 : vector<16x1xf32> to vector<16x20xf32>
    %29 = arith.subf %23, %28 : vector<16x20xf32>
    %c0_19 = arith.constant 0 : index
    %c0_20 = arith.constant 0 : index
    %30 = vector.load %arg8[%c0_19, %c0_20] : memref<16x20xf32, #tpu.memory_space<vmem>>, vector<16x20xf32>
    tpu.vector_store %arg8[%c0_19, %c0_20], %29 {strides = array<i32>} : memref<16x20xf32, #tpu.memory_space<vmem>>, vector<16x20xf32>,
    return
  }
  func.func @transform_0(%arg0: i32) -> (i32, i32) {
    %c0_i32 = arith.constant 0 : i32
    %c0_i32_0 = arith.constant 0 : i32
    return %arg0, %c0_i32 : i32, i32
  }
  func.func @transform_1(%arg0: i32) -> (i32, i32) {
    %c0_i32 = arith.constant 0 : i32
    %c0_i32_0 = arith.constant 0 : i32
    %c0_i32_1 = arith.constant 0 : i32
    return %c0_i32, %c0_i32_0 : i32, i32
  }
  func.func @transform_2(%arg0: i32) -> (i32, i32) {
    %c0_i32 = arith.constant 0 : i32
    %c0_i32_0 = arith.constant 0 : i32
    %c0_i32_1 = arith.constant 0 : i32
    return %c0_i32, %c0_i32_0 : i32, i32
  }
  func.func @transform_3(%arg0: i32) -> (i32, i32) {
    %c0_i32 = arith.constant 0 : i32
    %c0_i32_0 = arith.constant 0 : i32
    %c0_i32_1 = arith.constant 0 : i32
    return %c0_i32, %c0_i32_0 : i32, i32
  }
  func.func @transform_4(%arg0: i32) -> (i32, i32) {
    %c0_i32 = arith.constant 0 : i32
    %c0_i32_0 = arith.constant 0 : i32
    %c0_i32_1 = arith.constant 0 : i32
    return %c0_i32, %c0_i32_0 : i32, i32
  }
  func.func @transform_5(%arg0: i32) -> (i32, i32) {
    %c0_i32 = arith.constant 0 : i32
    %c0_i32_0 = arith.constant 0 : i32
    %c0_i32_1 = arith.constant 0 : i32
    return %c0_i32, %c0_i32_0 : i32, i32
  }
  func.func @transform_6(%arg0: i32) -> (i32, i32) {
    %c0_i32 = arith.constant 0 : i32
    %c0_i32_0 = arith.constant 0 : i32
    %c0_i32_1 = arith.constant 0 : i32
    return %c0_i32, %c0_i32_0 : i32, i32
  }
  func.func @transform_7(%arg0: i32) -> (i32, i32) {
    %c0_i32 = arith.constant 0 : i32
    %c0_i32_0 = arith.constant 0 : i32
    return %arg0, %c0_i32 : i32, i32
  }
}

</mosaic_0001>

<bundles_post_ra>
// kernel: output_sequence_layer.1
= control target key start
LH: loop header
LB: loop body
LE: loop exit
PB: predicated region body
PF: predicated region fallthrough
CT: control target
= control target key end

     0   :  { %12 = vsyncpa [#allocation3], 0  ;;  %s643_s0 = inlined_call_operand.hbm [shape: f32[16,32], index: 0, kind: input, shape index: {}]   ;;  %s644_s1 = inlined_call_operand.vmem [shape: f32[32,32], index: 1, kind: input, shape index: {}]   ;;  %s645_s2 = inlined_call_operand.vmem [shape: f32[1,32], index: 2, kind: input, shape index: {}]   ;;  %s646_s3 = inlined_call_operand.vmem [shape: f32[32,32], index: 3, kind: input, shape index: {}]   ;;  %s647_s4 = inlined_call_operand.vmem [shape: f32[1,32], index: 4, kind: input, shape index: {}]   ;;  %s648_s5 = inlined_call_operand.vmem [shape: f32[32,20], index: 5, kind: input, shape index: {}]   ;;  %s649_s6 = inlined_call_operand.vmem [shape: f32[1,20], index: 6, kind: input, shape index: {}]   ;;  %s650_s7 = inlined_call_operand.hbm [shape: f32[16,20], index: 7, kind: output, shape index: {}]  }
   0x1   :  { %13 = vsyncpa [#allocation4], 0  ;;  %s512_s24 = smov [#allocation2]   ;;  %s464_s28 = scalar_lea.hbm %s643_s0, 256 }
   0x2   :  { %s19_s25 = sshll.u32 %s512_s24, 4  ;;  %p465_p0 = scmp.ne.s32.totalorder %s643_s0, %s464_s28  ;;  %s20_s25 = int_to_ptr.vmem [resolvable:$true] %s19_s25 }
   0x3   :  { %p468_p1 = scmp.lt.u32.totalorder %s464_s28, %s643_s0 }
   0x5   :  { %p470_p2 = pnand %p468_p1, %p465_p0 }
   0x7   :  { %473 = shalt.err (!%p470_p2)
}
   0x8   :  { %s474_s10 = scalar_lea.vmem %s20_s25, 256  ;;  %p479_p4 = scmp.lt.s32.totalorder %s20_s25, %s20_s25 }
   0x9   :  { %p475_p3 = scmp.ne.s32.totalorder %s20_s25, %s474_s10  ;;  %p480_p5 = scmp.lt.s32.totalorder %s474_s10, %s474_s10 }
   0xb   :  { %p481_p6 = por %p480_p5, %p479_p4 }
   0xd   :  { %p482_p7 = pnand %p481_p6, %p475_p3 }
   0xf   :  { %485 = shalt.err (!%p482_p7)
}
  0x10   :  { %s513_s11 = smov 128   ;;  %s514_s12 = smov 8  }
  0x11   :  { %25 = dma.hbm_to_vmem [thread:$0]  %s643_s0, 256, %s20_s25, [#allocation3], %s513_s11, %s513_s11, %s514_s12  }
  0x12   :  { %508 = dma.done.wait [#allocation3], 256  }
  0x13   :  { %509 = vsyncadd [#allocation3], 4294967040  ;;  %vm54_vm0 = vcmask 261120   ;;  %v43_v0 = vld [vmem:[%s644_s1] sm:$0xff]  ;;  %v44_v1 = vld [vmem:[%s644_s1 + $0x8] sm:$0xff]  ;;  %vm324_vm1 = vcmask 162816  }
  0x14   :  { %v45_v2 = vld [vmem:[%s644_s1 + $0x10] sm:$0xff]  ;;  %v428_v3 = vpack.c.bf16 %v44_v1, %v43_v0  ;;  %v46_v4 = vld [vmem:[%s644_s1 + $0x18] sm:$0xff]  ;;  %v41_v5 = vld [vmem:[#allocation2] sm:$0xff] }
  0x15   :  { %v432_v6 = vpack.c.bf16 %v46_v4, %v45_v2  ;;  %403 = vmatprep.mubr.msk.f32.mxu0 %vm54_vm0, %v41_v5  ;;  %v138_v7 = vld [vmem:[%s646_s3] sm:$0xff]  ;;  %v139_v8 = vld [vmem:[%s646_s3 + $0x8] sm:$0xff]  ;;  %v140_v11 = vld [vmem:[%s646_s3 + $0x10] sm:$0xff] }
  0x16   :  { %429 = vmatprep.subr.bf16.mxu0 %v428_v3  ;;  %v436_v9 = vpack.c.bf16 %v139_v8, %v138_v7  ;;  %v42_v10 = vld [vmem:[#allocation2 + $0x8] sm:$0xff]  ;;  %v141_v12 = vld [vmem:[%s646_s3 + $0x18] sm:$0xff]  ;;  %v232_v14 = vld [vmem:[%s648_s5] sm:$0xff] }
  0x17   :  { %431 = vmatpush3.bf16.msra.mxu0 %v428_v3  ;;  %v440_v13 = vpack.c.bf16 %v141_v12, %v140_v11  ;;  %v233_v15 = vld [vmem:[%s648_s5 + $0x8] sm:$0xff]  ;;  %v368_v17 = vld [vmem:[%s645_s2] ss:$0 sm:$0xff]  ;;  %v234_v24 = vld [vmem:[%s648_s5 + $0x10] sm:$0xff] }
  0x18   :  { %433 = vmatprep.subr.bf16.mxu0 %v432_v6  ;;  %437 = vmatprep.subr.bf16.mxu1 %v436_v9  ;;  %v444_v16 = vpack.c.bf16 %v233_v15, %v232_v14  ;;  %v235_v25 = vld [vmem:[%s648_s5 + $0x18] sm:$0xff]  ;;  %v371_v27 = vld [vmem:[%s647_s4] ss:$0 sm:$0xff]  ;;  %s515_s4 = smov [#allocation5]  }
  0x19   :  { %439 = vmatpush3.bf16.msra.mxu1 %v436_v9  ;;  %v448_v26 = vpack.c.bf16 %v235_v25, %v234_v24  ;;  %v374_v34 = vld [vmem:[%s649_s6] ss:$0 sm:$0xff]  ;;  %s356_s5 = sshll.u32 %s515_s4, 4  ;;  %s357_s5 = int_to_ptr.vmem [resolvable:$true] %s356_s5 }
  0x1a   :  { %441 = vmatprep.subr.bf16.mxu1 %v440_v13  ;;  %s486_s6 = scalar_lea.vmem %s357_s5, 256  ;;  %p491_p9 = scmp.lt.s32.totalorder %s357_s5, %s357_s5 }
  0x1b   :  { %435 = vmatpush3.bf16.msra.mxu0 %v432_v6  ;;  %p487_p8 = scmp.ne.s32.totalorder %s357_s5, %s486_s6  ;;  %p492_p10 = scmp.lt.s32.totalorder %s486_s6, %s486_s6 }
  0x1c   :  { %445 = vmatprep.subr.bf16.mxu0 %v444_v16 }
  0x1d   :  { %443 = vmatpush3.bf16.msra.mxu1 %v440_v13  ;;  %p493_p11 = por %p492_p10, %p491_p9 }
  0x1e   :  { %404 = vmatmul.mubr.msk.f32.vlgmr.msra.gmra.mrb[0].mxu0 %vm54_vm0, %v42_v10 }
  0x1f   :  { %447 = vmatpush3.bf16.msra.mxu0 %v444_v16  ;;  %p494_p12 = pnand %p493_p11, %p487_p8 }
  0x20   :  { %449 = vmatprep.subr.bf16.mxu0 %v448_v26 }
  0x23   :  { %451 = vmatpush3.bf16.msra.mxu0 %v448_v26 }
  0xf1   :  { %v405_v18 = vpop.f32.mrb[0].mxu0 }
  0xf2   :  { %v133_v19 = vadd.f32 %v405_v18, %v368_v17  ;;  %v127_v20 = vpop.f32.mrb[1].mxu0 }
  0xf3   :  { %v128_v21 = vadd.f32 %v368_v17, %v127_v20 }
  0xf4   :  { %v137_v23 = vmax.f32 %v133_v19, 0.0 }
  0xf5   :  { %v136_v22 = vmax.f32 %v128_v21, 0.0 }
  0xf7   :  { %414 = vmatprep.mubr.msk.f32.mxu1 %vm54_vm0, %v136_v22 }
  0xf8   :  { %415 = vmatmul.mubr.msk.f32.vlgmr.msra.gmra.mrb[0].mxu1 %vm54_vm0, %v137_v23 }
 0x1cb   :  { %v416_v28 = vpop.f32.mrb[0].mxu1 }
 0x1cc   :  { %v227_v29 = vadd.f32 %v416_v28, %v371_v27  ;;  %v221_v30 = vpop.f32.mrb[1].mxu1 }
 0x1cd   :  { %v222_v31 = vadd.f32 %v371_v27, %v221_v30 }
 0x1ce   :  { %v231_v33 = vmax.f32 %v227_v29, 0.0 }
 0x1cf   :  { %v230_v32 = vmax.f32 %v222_v31, 0.0 }
 0x1d1   :  { %425 = vmatprep.mubr.msk.f32.mxu0 %vm54_vm0, %v230_v32 }
 0x1d2   :  { %426 = vmatmul.mubr.msk.f32.vlgmr.msra.gmra.mrb[2].mxu0 %vm54_vm0, %v231_v33 }
 0x2a5   :  { %v427_v35 = vpop.f32.mrb[2].mxu0 }
 0x2a6   :  { %v315_v36 = vpop.f32.mrb[3].mxu0  ;;  %v321_v38 = vadd.f32 %v427_v35, %v374_v34 }
 0x2a7   :  { %v316_v37 = vadd.f32 %v374_v34, %v315_v36 }
 0x2a8   :  { %v328_v40 = vsel %vm324_vm1, %v321_v38, -inf }
 0x2a9   :  { %v325_v39 = vsel %vm324_vm1, %v316_v37, -inf }
 0x2aa   :  { %326 = vmax.xlane.f32.xlu0 %v325_v39 }
 0x2ae   :  { %329 = vmax.xlane.f32.xlu0 %v328_v40 }
 0x337   :  { %v327_v41 = vpop.xlane.xlu0 %326 }
 0x338   :  { %v331_v42 = vsub.f32 %v316_v37, %v327_v41 }
 0x33a   :  { %v333_v43 = vmul.f32 1.442695, %v331_v42 }
 0x33b   :  { %v330_v44 = vpop.xlane.xlu0 %329 }
 0x33c   :  { %456 = vpow2.f32 %v333_v43  ;;  %v332_v45 = vsub.f32 %v321_v38, %v330_v44 }
 0x33e   :  { %v335_v46 = vmul.f32 1.442695, %v332_v45 }
 0x340   :  { %458 = vpow2.f32 %v335_v46 }
 0x346   :  { %v457_v47 = vpop.eup %456 }
 0x347   :  { %v337_v48 = vsel %vm324_vm1, %v457_v47, 0.0 }
 0x348   :  { %338 = vadd.xlane.f32.xlu1 %v337_v48 }
 0x34a   :  { %v459_v49 = vpop.eup %458 }
 0x34b   :  { %v340_v50 = vsel %vm324_vm1, %v459_v49, 0.0 }
 0x34c   :  { %341 = vadd.xlane.f32.xlu1 %v340_v50 }
 0x3d5   :  { %v339_v51 = vpop.xlane.xlu1 %338 }
 0x3d6   :  { %460 = vlog2.f32 %v339_v51 }
 0x3d9   :  { %v342_v52 = vpop.xlane.xlu1 %341 }
 0x3da   :  { %462 = vlog2.f32 %v342_v52 }
 0x3e0   :  { %v461_v53 = vpop.eup %460 }
 0x3e1   :  { %v344_v54 = vmul.f32 0.6931472, %v461_v53 }
 0x3e3   :  { %v347_v55 = vsub.f32 %v331_v42, %v344_v54 }
 0x3e4   :  { %v463_v56 = vpop.eup %462 }
 0x3e5   :  { %349 = vst.msk [vmem:[#allocation5] sm:$0xff] %vm324_vm1, %v347_v55  ;;  %v346_v57 = vmul.f32 0.6931472, %v463_v56 }
 0x3e7   :  { %v348_v58 = vsub.f32 %v332_v45, %v346_v57 }
 0x3e9   :  { %350 = vst.msk [vmem:[#allocation5 + $0x8] sm:$0xff] %vm324_vm1, %v348_v58 }
 0x3ea   :  { %497 = shalt.err (!%p494_p12)
}
 0x3eb   :  { %s498_s22 = scalar_lea.hbm %s650_s7, 256 }
 0x3ec   :  { %p499_p13 = scmp.ne.s32.totalorder %s650_s7, %s498_s22  ;;  %p502_p0 = scmp.lt.u32.totalorder %s498_s22, %s650_s7 }
 0x3ee   :  { %p504_p1 = pnand %p502_p0, %p499_p13 }
 0x3f0   :  { %507 = shalt.err (!%p504_p1)
}
 0x3f1   :  { %362 = dma.vmem_to_hbm [thread:$0]  %s357_s5, 256, %s650_s7, [#allocation4], %s513_s11, %s513_s11, %s514_s12  }
 0x3f2   :  { %510 = dma.done.wait [#allocation4], 256  }
 0x3f3   :  { %511 = vsyncadd [#allocation4], 4294967040 }
 0x3f4   :  { %366 = vsyncpa [#allocation3], 1 }
 0x3f5   :  { %367 = vsyncpa [#allocation4], 1 }

</bundles_post_ra>
